<compile_context>
chip_gen: v7x
topology: tpu7x:2x2x1
jax: 0.10.0
libtpu: 0.0.40
codegen_flags: <defaults>
</compile_context>

<pallas_src>
import functools

import jax
import jax.numpy as jnp
from jax.experimental import pallas as pl
from jax.experimental.pallas import tpu as pltpu


# ------------------------------ Pallas kernel -------------------------------

def _decoder_step_kernel(g_ref, wt_ref, bm_ref, st_ref, a_ref,
                         wg_ref, bg_ref,
                         w1_ref, b1_ref, w2_ref, b2_ref, w3t_ref, b3t_ref,
                         out_ref, res_ref, *, ms, out_dim, lag):
    """One (batch b, horizon t) decoder step.

    g_ref   : (1, lag, N, H)  encoder output for batch b (resident across t)
    wt_ref  : (T, lag)  SMEM  mlp weight (transposed);  bm_ref : (T,) SMEM
    st_ref  : (1, 1, N, H)    Transform state block for (b, t)   [pipelined]
    a_ref   : (N, N)          adaptive adjacency               [resident]
    wg/bg, w1/b1, w2/b2       GCN + end_conv weights           [resident]
    w3t_ref : (O, H), b3t_ref : (O, 1)  last end_conv layer, pre-transposed
    out_ref : (1, 1, N, H)    res_ref : (1, 1, O, N)
    """
    t = pl.program_id(1)
    H = wg_ref.shape[0]

    # --- fused time-mixing mlp: gh_t = sum_l W_mlp[l, t] * g[b, l] + b_mlp[t] ---
    gh_t = wt_ref[t, 0] * g_ref[0, 0]
    for l in range(1, lag):                        # static unroll (lag is small)
        gh_t = gh_t + wt_ref[t, l] * g_ref[0, l]
    gh_t = gh_t + bm_ref[t]                        # (N, H)

    # --- adaptive GCN: tanh((A @ gh_t) @ W + b) ---
    # TODO(synk): ANodeGCN class not provided upstream; AGCRN-style stand-in.
    ag = jnp.dot(a_ref[...], gh_t, preferred_element_type=jnp.float32)
    gcn = jnp.tanh(jnp.dot(ag, wg_ref[...], preferred_element_type=jnp.float32)
                   + bg_ref[...])                  # (N, H)

    # --- per-group attention: x_g = -softmax(th_g th_g^T / sqrt(D)) @ ct_g ---
    # Lane masks instead of D-offset lane slices: every matmul stays full-width
    # and lane-dense, and each group's contribution lands at its own lanes
    # without any concatenate or relayout.
    st_t = st_ref[0, 0]                            # (N, H)
    scale = 1.0 / (out_dim ** 0.5)
    lane = jax.lax.broadcasted_iota(jnp.int32, (1, H), 1)
    o_t = gh_t                                     # residual; subtract group outputs
    for gi in range(ms):                           # static unroll (ms is small)
        m = ((lane >= gi * out_dim) & (lane < (gi + 1) * out_dim)
             ).astype(jnp.float32)                 # (1, H)
        s = jnp.einsum('nd,md->nm', st_t * m, st_t,
                       preferred_element_type=jnp.float32) * scale
        s = s - jnp.max(s, axis=-1, keepdims=True)
        p = jnp.exp(s)
        p = p * pl.reciprocal(jnp.sum(p, axis=-1, keepdims=True), approx=True)
        o_t = o_t - jnp.einsum('nm,md->nd', p, gcn * m,
                               preferred_element_type=jnp.float32)
    out_ref[0, 0] = o_t                            # (N, H), lane-dense over H

    # --- end_conv: three chained Linears (no activation, as in torch) ---
    h = jnp.dot(o_t, w1_ref[...], preferred_element_type=jnp.float32) + b1_ref[...]
    h = jnp.dot(h, w2_ref[...], preferred_element_type=jnp.float32) + b2_ref[...]
    # last layer computed directly in (O, N) orientation -> lane-dense res store
    r = jnp.einsum('oh,nh->on', w3t_ref[...], h,
                   preferred_element_type=jnp.float32) + b3t_ref[...]
    res_ref[0, 0] = r                              # (O, N)


def fused_decoder(g, state, w_mlp, b_mlp, A, wg, bg, w1, b1, w2, b2, w3, b3,
                  *, ms, out_dim):
    """g: (B, lag, N, H); state: (B, T, N, H) -> out (B,T,N,H), res (B,T,O,N)."""
    B, L, N, H = g.shape
    T = state.shape[1]
    O = w3.shape[1]
    assert ms * out_dim == H

    wt = w_mlp.T.astype(jnp.float32)               # (T, L)  tiny -> SMEM
    bm = b_mlp.reshape(T).astype(jnp.float32)      # (T,)    tiny -> SMEM
    w3t = w3.T                                     # (O, H)
    b3t = b3.reshape(O, 1)                         # (O, 1)

    kern = functools.partial(_decoder_step_kernel, ms=ms, out_dim=out_dim, lag=L)

    def resident(shape):                           # same block at every grid step
        return pl.BlockSpec(shape, lambda b, t: (0,) * len(shape))

    smem = pl.BlockSpec(memory_space=pltpu.MemorySpace.SMEM)

    return pl.pallas_call(
        kern,
        out_shape=(jax.ShapeDtypeStruct((B, T, N, H), jnp.float32),
                   jax.ShapeDtypeStruct((B, T, O, N), jnp.float32)),
        grid=(B, T),
        in_specs=[
            pl.BlockSpec((1, L, N, H), lambda b, t: (b, 0, 0, 0)),   # g (per-b resident)
            smem,                                                    # W_mlp^T
            smem,                                                    # b_mlp
            pl.BlockSpec((1, 1, N, H), lambda b, t: (b, t, 0, 0)),   # state (pipelined)
            resident((N, N)),                                        # adjacency A
            resident((H, H)), resident((1, H)),                      # GCN
            resident((H, H)), resident((1, H)),                      # end_conv 1
            resident((H, H)), resident((1, H)),                      # end_conv 2
            resident((O, H)), resident((O, 1)),                      # end_conv 3 (transposed)
        ],
        out_specs=(pl.BlockSpec((1, 1, N, H), lambda b, t: (b, t, 0, 0)),
                   pl.BlockSpec((1, 1, O, N), lambda b, t: (b, t, 0, 0))),
        compiler_params=pltpu.CompilerParams(
            # batch -> megacore on v7x; horizon -> pipelined sequential axis.
            dimension_semantics=("parallel", "arbitrary")),
    )(g, wt, bm, state, A, wg, bg, w1, b1, w2, b2, w3t, b3t)


# --------------------------- parameter construction ------------------------

def make_params(key, *, input_dim, H, N, ada_dim, c_t, lag, horizon, output_dim):
    ks = jax.random.split(key, 16)
    n = lambda i, shape, s=0.1: (s * jax.random.normal(ks[i], shape)).astype(jnp.float32)
    return {
        # TODO(synk): RNN g_encoder class not provided upstream; linear stand-in params.
        "W_enc": n(0, (input_dim, H)), "b_enc": n(1, (1, H)),
        # TODO(synk): Transform class not provided upstream; stand-in params.
        "W_s1": n(2, (H, H)), "W_s2": n(3, (c_t, H)), "b_s": n(4, (1, H)),
        # mlp Linear(lag, horizon)
        "W_mlp": n(5, (lag, horizon)), "b_mlp": n(6, (1, horizon)),
        # ANodeDecoder adaptive-graph embeddings
        # (Qt/qr gating params omitted: dead code in the reference forward.)
        "emb": n(7, (N, ada_dim), 1.0),
        # TODO(synk): ANodeGCN class not provided upstream; AGCRN-style stand-in params.
        "W_gcn": n(8, (H, H)), "b_gcn": n(9, (1, H)),
        # end_conv
        "W_e1": n(10, (H, H)), "b_e1": n(11, (1, H)),
        "W_e2": n(12, (H, H)), "b_e2": n(13, (1, H)),
        "W_e3": n(14, (H, output_dim)), "b_e3": n(15, (1, output_dim)),
    }


# ------------------------------- forward pass ------------------------------

def physics_st_forward(params, source, condition, disease, *,
                       lag, horizon, ms, output_dim):
    # condition[:, lag+t] / disease[:, lag+t] feed only the decoder's Qt/qr
    # gating branch, which never reaches the returned tensors (dead code).
    del disease
    B, _, N, _ = source.shape
    H = params["W_enc"].shape[1]
    out_dim = H // ms

    # --- g_encoder (RNN) ---
    # TODO(synk): RNN definition not provided; deterministic tanh-linear stand-in.
    g_output = jnp.tanh(source @ params["W_enc"] + params["b_enc"])      # (B, lag, N, H)

    # --- Transform ---
    # TODO(synk): Transform definition not provided; deterministic stand-in (B, horizon, N, H).
    cond_fut = condition[:, -horizon:, :]                                 # (B, horizon, c_t)
    state = jnp.tanh(g_output[:, -horizon:] @ params["W_s1"]
                     + (cond_fut @ params["W_s2"])[:, :, None, :]
                     + params["b_s"])                                     # (B, horizon, N, H)

    # adaptive adjacency for the GCN stand-in (computed once per forward)
    E = params["emb"]
    A = jax.nn.softmax(jax.nn.relu(E @ E.T), axis=-1)                     # (N, N)

    # --- fused decoder: time-mixing mlp + GCN + grouped attention + residual
    #     + end_conv, all inside one pallas_call over grid (B, horizon) ---
    outputs, results = fused_decoder(
        g_output, state, params["W_mlp"], params["b_mlp"], A,
        params["W_gcn"], params["b_gcn"],
        params["W_e1"], params["b_e1"],
        params["W_e2"], params["b_e2"],
        params["W_e3"], params["b_e3"],
        ms=ms, out_dim=out_dim)

    # outputs: (B, T, N, H) -> (B, T*H, N, 1); results: (B, T, O, N) -> (B, T*O, N, 1)
    out1 = outputs.transpose(0, 1, 3, 2).reshape(B, horizon * H, N)[..., None]
    out2 = results.reshape(B, horizon * output_dim, N)[..., None]
    return out1, out2


# ----------------------------------- main -----------------------------------

if __name__ == "__main__":
    # small, module-consistent shapes
    B, N = 2, 16
    input_dim = 2
    H = 32            # rnn_units / hidden_dim / latent_dim
    output_dim = 1
    lag, horizon = 8, 4
    ms = 2            # out_dim = H // ms = 16
    c_t = 4           # c_t // 4 == 1 (required by first_layers_qr slicing)
    ada_dim = 8
    disease_dim = 3

    key = jax.random.PRNGKey(0)
    k_par, k_src, k_cond, k_dis = jax.random.split(key, 4)

    params = make_params(k_par, input_dim=input_dim, H=H, N=N, ada_dim=ada_dim,
                         c_t=c_t, lag=lag, horizon=horizon, output_dim=output_dim)

    source = jax.random.normal(k_src, (B, lag, N, input_dim), dtype=jnp.float32)
    condition = jax.random.normal(k_cond, (B, lag + horizon, c_t), dtype=jnp.float32)
    disease = jax.random.normal(k_dis, (B, lag + horizon, disease_dim), dtype=jnp.float32)

    fwd = jax.jit(functools.partial(physics_st_forward, lag=lag, horizon=horizon,
                                    ms=ms, output_dim=output_dim))
    out1, out2 = fwd(params, source, condition, disease)
    out1 = jax.block_until_ready(out1)
    out2 = jax.block_until_ready(out2)

    assert out1.shape == (B, horizon * H, N, 1), out1.shape
    assert out2.shape == (B, horizon * output_dim, N, 1), out2.shape
    assert jnp.all(jnp.isfinite(out1)) and jnp.all(jnp.isfinite(out2))
    print("KERNEL_OK")
</pallas_src>

<mosaic_0001>
module attributes {stable_mosaic.version = 11 : i64} {
  func.func @_decoder_step_kernel(%arg0: i32, %arg1: i32, %arg2: memref<1x8x16x32xf32, #tpu.memory_space<vmem>>, %arg3: memref<4x8xf32, #tpu.memory_space<smem>>, %arg4: memref<4xf32, #tpu.memory_space<smem>>, %arg5: memref<1x1x16x32xf32, #tpu.memory_space<vmem>>, %arg6: memref<16x16xf32, #tpu.memory_space<vmem>>, %arg7: memref<32x32xf32, #tpu.memory_space<vmem>>, %arg8: memref<1x32xf32, #tpu.memory_space<vmem>>, %arg9: memref<32x32xf32, #tpu.memory_space<vmem>>, %arg10: memref<1x32xf32, #tpu.memory_space<vmem>>, %arg11: memref<32x32xf32, #tpu.memory_space<vmem>>, %arg12: memref<1x32xf32, #tpu.memory_space<vmem>>, %arg13: memref<1x32xf32, #tpu.memory_space<vmem>>, %arg14: memref<1x1xf32, #tpu.memory_space<vmem>>, %arg15: memref<1x1x16x32xf32, #tpu.memory_space<vmem>>, %arg16: memref<1x1x1x16xf32, #tpu.memory_space<vmem>>) attributes {dimension_semantics = [#tpu.dimension_semantics<parallel>, #tpu.dimension_semantics<arbitrary>], iteration_bounds = array<i64: 2, 4>, scalar_prefetch = 0 : i64, scratch_operands = 0 : i64, tpu.core_type = #tpu.core_type<tc>, window_params = [{transform_indices = @transform_0, window_bounds = array<i64: 1, 8, 16, 32>}, {transform_indices = @transform_1, window_bounds = array<i64: 4, 8>}, {transform_indices = @transform_2, window_bounds = array<i64: 4>}, {transform_indices = @transform_3, window_bounds = array<i64: 1, 1, 16, 32>}, {pipeline_mode = #tpu.pipeline_mode<synchronous>, transform_indices = @transform_4, window_bounds = array<i64: 16, 16>}, {pipeline_mode = #tpu.pipeline_mode<synchronous>, transform_indices = @transform_5, window_bounds = array<i64: 32, 32>}, {pipeline_mode = #tpu.pipeline_mode<synchronous>, transform_indices = @transform_6, window_bounds = array<i64: 1, 32>}, {pipeline_mode = #tpu.pipeline_mode<synchronous>, transform_indices = @transform_7, window_bounds = array<i64: 32, 32>}, {pipeline_mode = #tpu.pipeline_mode<synchronous>, transform_indices = @transform_8, window_bounds = array<i64: 1, 32>}, {pipeline_mode = #tpu.pipeline_mode<synchronous>, transform_indices = @transform_9, window_bounds = array<i64: 32, 32>}, {pipeline_mode = #tpu.pipeline_mode<synchronous>, transform_indices = @transform_10, window_bounds = array<i64: 1, 32>}, {pipeline_mode = #tpu.pipeline_mode<synchronous>, transform_indices = @transform_11, window_bounds = array<i64: 1, 32>}, {pipeline_mode = #tpu.pipeline_mode<synchronous>, transform_indices = @transform_12, window_bounds = array<i64: 1, 1>}, {transform_indices = @transform_13, window_bounds = array<i64: 1, 1, 16, 32>}, {transform_indices = @transform_14, window_bounds = array<i64: 1, 1, 1, 16>}]} {
    %0 = arith.index_cast %arg1 : i32 to index
    %c0 = arith.constant 0 : index
    %1 = memref.load %arg3[%0, %c0] : memref<4x8xf32, #tpu.memory_space<smem>>
    %c0_0 = arith.constant 0 : index
    %c0_1 = arith.constant 0 : index
    %c0_2 = arith.constant 0 : index
    %c0_3 = arith.constant 0 : index
    %2 = vector.load %arg2[%c0_0, %c0_1, %c0_2, %c0_3] : memref<1x8x16x32xf32, #tpu.memory_space<vmem>>, vector<1x1x16x32xf32>
    %3 = vector.shape_cast %2 : vector<1x1x16x32xf32> to vector<16x32xf32>
    %4 = vector.broadcast %1 : f32 to vector<16x32xf32>
    %5 = arith.mulf %4, %3 : vector<16x32xf32>
    %6 = arith.index_cast %arg1 : i32 to index
    %c1 = arith.constant 1 : index
    %7 = memref.load %arg3[%6, %c1] : memref<4x8xf32, #tpu.memory_space<smem>>
    %c0_4 = arith.constant 0 : index
    %c1_5 = arith.constant 1 : index
    %c0_6 = arith.constant 0 : index
    %c0_7 = arith.constant 0 : index
    %8 = vector.load %arg2[%c0_4, %c1_5, %c0_6, %c0_7] : memref<1x8x16x32xf32, #tpu.memory_space<vmem>>, vector<1x1x16x32xf32>
    %9 = vector.shape_cast %8 : vector<1x1x16x32xf32> to vector<16x32xf32>
    %10 = vector.broadcast %7 : f32 to vector<16x32xf32>
    %11 = arith.mulf %10, %9 : vector<16x32xf32>
    %12 = arith.addf %5, %11 : vector<16x32xf32>
    %13 = arith.index_cast %arg1 : i32 to index
    %c2 = arith.constant 2 : index
    %14 = memref.load %arg3[%13, %c2] : memref<4x8xf32, #tpu.memory_space<smem>>
    %c0_8 = arith.constant 0 : index
    %c2_9 = arith.constant 2 : index
    %c0_10 = arith.constant 0 : index
    %c0_11 = arith.constant 0 : index
    %15 = vector.load %arg2[%c0_8, %c2_9, %c0_10, %c0_11] : memref<1x8x16x32xf32, #tpu.memory_space<vmem>>, vector<1x1x16x32xf32>
    %16 = vector.shape_cast %15 : vector<1x1x16x32xf32> to vector<16x32xf32>
    %17 = vector.broadcast %14 : f32 to vector<16x32xf32>
    %18 = arith.mulf %17, %16 : vector<16x32xf32>
    %19 = arith.addf %12, %18 : vector<16x32xf32>
    %20 = arith.index_cast %arg1 : i32 to index
    %c3 = arith.constant 3 : index
    %21 = memref.load %arg3[%20, %c3] : memref<4x8xf32, #tpu.memory_space<smem>>
    %c0_12 = arith.constant 0 : index
    %c3_13 = arith.constant 3 : index
    %c0_14 = arith.constant 0 : index
    %c0_15 = arith.constant 0 : index
    %22 = vector.load %arg2[%c0_12, %c3_13, %c0_14, %c0_15] : memref<1x8x16x32xf32, #tpu.memory_space<vmem>>, vector<1x1x16x32xf32>
    %23 = vector.shape_cast %22 : vector<1x1x16x32xf32> to vector<16x32xf32>
    %24 = vector.broadcast %21 : f32 to vector<16x32xf32>
    %25 = arith.mulf %24, %23 : vector<16x32xf32>
    %26 = arith.addf %19, %25 : vector<16x32xf32>
    %27 = arith.index_cast %arg1 : i32 to index
    %c4 = arith.constant 4 : index
    %28 = memref.load %arg3[%27, %c4] : memref<4x8xf32, #tpu.memory_space<smem>>
    %c0_16 = arith.constant 0 : index
    %c4_17 = arith.constant 4 : index
    %c0_18 = arith.constant 0 : index
    %c0_19 = arith.constant 0 : index
    %29 = vector.load %arg2[%c0_16, %c4_17, %c0_18, %c0_19] : memref<1x8x16x32xf32, #tpu.memory_space<vmem>>, vector<1x1x16x32xf32>
    %30 = vector.shape_cast %29 : vector<1x1x16x32xf32> to vector<16x32xf32>
    %31 = vector.broadcast %28 : f32 to vector<16x32xf32>
    %32 = arith.mulf %31, %30 : vector<16x32xf32>
    %33 = arith.addf %26, %32 : vector<16x32xf32>
    %34 = arith.index_cast %arg1 : i32 to index
    %c5 = arith.constant 5 : index
    %35 = memref.load %arg3[%34, %c5] : memref<4x8xf32, #tpu.memory_space<smem>>
    %c0_20 = arith.constant 0 : index
    %c5_21 = arith.constant 5 : index
    %c0_22 = arith.constant 0 : index
    %c0_23 = arith.constant 0 : index
    %36 = vector.load %arg2[%c0_20, %c5_21, %c0_22, %c0_23] : memref<1x8x16x32xf32, #tpu.memory_space<vmem>>, vector<1x1x16x32xf32>
    %37 = vector.shape_cast %36 : vector<1x1x16x32xf32> to vector<16x32xf32>
    %38 = vector.broadcast %35 : f32 to vector<16x32xf32>
    %39 = arith.mulf %38, %37 : vector<16x32xf32>
    %40 = arith.addf %33, %39 : vector<16x32xf32>
    %41 = arith.index_cast %arg1 : i32 to index
    %c6 = arith.constant 6 : index
    %42 = memref.load %arg3[%41, %c6] : memref<4x8xf32, #tpu.memory_space<smem>>
    %c0_24 = arith.constant 0 : index
    %c6_25 = arith.constant 6 : index
    %c0_26 = arith.constant 0 : index
    %c0_27 = arith.constant 0 : index
    %43 = vector.load %arg2[%c0_24, %c6_25, %c0_26, %c0_27] : memref<1x8x16x32xf32, #tpu.memory_space<vmem>>, vector<1x1x16x32xf32>
    %44 = vector.shape_cast %43 : vector<1x1x16x32xf32> to vector<16x32xf32>
    %45 = vector.broadcast %42 : f32 to vector<16x32xf32>
    %46 = arith.mulf %45, %44 : vector<16x32xf32>
    %47 = arith.addf %40, %46 : vector<16x32xf32>
    %48 = arith.index_cast %arg1 : i32 to index
    %c7 = arith.constant 7 : index
    %49 = memref.load %arg3[%48, %c7] : memref<4x8xf32, #tpu.memory_space<smem>>
    %c0_28 = arith.constant 0 : index
    %c7_29 = arith.constant 7 : index
    %c0_30 = arith.constant 0 : index
    %c0_31 = arith.constant 0 : index
    %50 = vector.load %arg2[%c0_28, %c7_29, %c0_30, %c0_31] : memref<1x8x16x32xf32, #tpu.memory_space<vmem>>, vector<1x1x16x32xf32>
    %51 = vector.shape_cast %50 : vector<1x1x16x32xf32> to vector<16x32xf32>
    %52 = vector.broadcast %49 : f32 to vector<16x32xf32>
    %53 = arith.mulf %52, %51 : vector<16x32xf32>
    %54 = arith.addf %47, %53 : vector<16x32xf32>
    %55 = arith.index_cast %arg1 : i32 to index
    %56 = memref.load %arg4[%55] : memref<4xf32, #tpu.memory_space<smem>>
    %57 = vector.broadcast %56 : f32 to vector<16x32xf32>
    %58 = arith.addf %54, %57 : vector<16x32xf32>
    %c0_32 = arith.constant 0 : index
    %c0_33 = arith.constant 0 : index
    %59 = vector.load %arg6[%c0_32, %c0_33] : memref<16x16xf32, #tpu.memory_space<vmem>>, vector<16x16xf32>
    %cst = arith.constant dense<0.000000e+00> : vector<16x32xf32>
    %60 = tpu.matmul %59, %58, %cst {dimension_numbers = #tpu.dot_dimension_numbers<[1], [0], [0], [1], [0, 0, 1, 1], [], []>} : vector<16x16xf32>, vector<16x32xf32>, vector<16x32xf32> -> vector<16x32xf32>
    %c0_34 = arith.constant 0 : index
    %c0_35 = arith.constant 0 : index
    %61 = vector.load %arg7[%c0_34, %c0_35] : memref<32x32xf32, #tpu.memory_space<vmem>>, vector<32x32xf32>
    %cst_36 = arith.constant dense<0.000000e+00> : vector<16x32xf32>
    %62 = tpu.matmul %60, %61, %cst_36 {dimension_numbers = #tpu.dot_dimension_numbers<[1], [0], [0], [1], [0, 0, 1, 1], [], []>} : vector<16x32xf32>, vector<32x32xf32>, vector<16x32xf32> -> vector<16x32xf32>
    %c0_37 = arith.constant 0 : index
    %c0_38 = arith.constant 0 : index
    %63 = vector.load %arg8[%c0_37, %c0_38] : memref<1x32xf32, #tpu.memory_space<vmem>>, vector<1x32xf32>
    %64 = vector.broadcast %63 : vector<1x32xf32> to vector<16x32xf32>
    %65 = arith.addf %62, %64 : vector<16x32xf32>
    %66 = math.tanh %65 : vector<16x32xf32>
    %c0_39 = arith.constant 0 : index
    %c0_40 = arith.constant 0 : index
    %c0_41 = arith.constant 0 : index
    %c0_42 = arith.constant 0 : index
    %67 = vector.load %arg5[%c0_39, %c0_40, %c0_41, %c0_42] : memref<1x1x16x32xf32, #tpu.memory_space<vmem>>, vector<1x1x16x32xf32>
    %68 = vector.shape_cast %67 : vector<1x1x16x32xf32> to vector<16x32xf32>
    %69 = tpu.iota {dimensions = array<i32: 1>} : vector<1x32xi32>
    %c0_i32 = arith.constant 0 : i32
    %70 = vector.broadcast %c0_i32 : i32 to vector<1x32xi32>
    %71 = arith.cmpi sge, %69, %70 : vector<1x32xi32>
    %c16_i32 = arith.constant 16 : i32
    %72 = vector.broadcast %c16_i32 : i32 to vector<1x32xi32>
    %73 = arith.cmpi slt, %69, %72 : vector<1x32xi32>
    %74 = arith.andi %71, %73 : vector<1x32xi1>
    %75 = arith.extui %74 : vector<1x32xi1> to vector<1x32xi32>
    %76 = arith.sitofp %75 : vector<1x32xi32> to vector<1x32xf32>
    %77 = vector.broadcast %76 : vector<1x32xf32> to vector<16x32xf32>
    %78 = arith.mulf %68, %77 : vector<16x32xf32>
    "tpu.trace_start"() <{level = 10 : i32, message = "nd,md->nm"}> : () -> ()
    %cst_43 = arith.constant dense<0.000000e+00> : vector<16x16xf32>
    %79 = tpu.matmul %78, %68, %cst_43 {dimension_numbers = #tpu.dot_dimension_numbers<[1], [1], [0], [0], [0, 0, 1, 0], [], []>} : vector<16x32xf32>, vector<16x32xf32>, vector<16x16xf32> -> vector<16x16xf32>
    "tpu.trace_stop"() : () -> ()
    %cst_44 = arith.constant 2.500000e-01 : f32
    %80 = vector.broadcast %cst_44 : f32 to vector<16x16xf32>
    %81 = arith.mulf %79, %80 : vector<16x16xf32>
    %cst_45 = arith.constant dense<0xFF800000> : vector<16xf32>
    %82 = vector.multi_reduction <maximumf>, %81, %cst_45 [1] : vector<16x16xf32> to vector<16xf32>
    %83 = vector.shape_cast %82 : vector<16xf32> to vector<16x1xf32>
    %84 = vector.broadcast %83 : vector<16x1xf32> to vector<16x16xf32>
    %85 = arith.subf %81, %84 : vector<16x16xf32>
    %86 = math.exp %85 : vector<16x16xf32>
    %cst_46 = arith.constant dense<0.000000e+00> : vector<16xf32>
    %87 = vector.multi_reduction <add>, %86, %cst_46 [1] : vector<16x16xf32> to vector<16xf32>
    %88 = vector.shape_cast %87 : vector<16xf32> to vector<16x1xf32>
    %89 = tpu.reciprocal %88 {approx = true} : vector<16x1xf32> -> vector<16x1xf32>
    %90 = vector.broadcast %89 : vector<16x1xf32> to vector<16x16xf32>
    %91 = arith.mulf %86, %90 : vector<16x16xf32>
    %92 = vector.broadcast %76 : vector<1x32xf32> to vector<16x32xf32>
    %93 = arith.mulf %66, %92 : vector<16x32xf32>
    "tpu.trace_start"() <{level = 10 : i32, message = "nm,md->nd"}> : () -> ()
    %cst_47 = arith.constant dense<0.000000e+00> : vector<16x32xf32>
    %94 = tpu.matmul %91, %93, %cst_47 {dimension_numbers = #tpu.dot_dimension_numbers<[1], [0], [0], [1], [0, 0, 1, 1], [], []>} : vector<16x16xf32>, vector<16x32xf32>, vector<16x32xf32> -> vector<16x32xf32>
    "tpu.trace_stop"() : () -> ()
    %95 = arith.subf %58, %94 : vector<16x32xf32>
    %c16_i32_48 = arith.constant 16 : i32
    %96 = vector.broadcast %c16_i32_48 : i32 to vector<1x32xi32>
    %97 = arith.cmpi sge, %69, %96 : vector<1x32xi32>
    %c32_i32 = arith.constant 32 : i32
    %98 = vector.broadcast %c32_i32 : i32 to vector<1x32xi32>
    %99 = arith.cmpi slt, %69, %98 : vector<1x32xi32>
    %100 = arith.andi %97, %99 : vector<1x32xi1>
    %101 = arith.extui %100 : vector<1x32xi1> to vector<1x32xi32>
    %102 = arith.sitofp %101 : vector<1x32xi32> to vector<1x32xf32>
    %103 = vector.broadcast %102 : vector<1x32xf32> to vector<16x32xf32>
    %104 = arith.mulf %68, %103 : vector<16x32xf32>
    "tpu.trace_start"() <{level = 10 : i32, message = "nd,md->nm"}> : () -> ()
    %cst_49 = arith.constant dense<0.000000e+00> : vector<16x16xf32>
    %105 = tpu.matmul %104, %68, %cst_49 {dimension_numbers = #tpu.dot_dimension_numbers<[1], [1], [0], [0], [0, 0, 1, 0], [], []>} : vector<16x32xf32>, vector<16x32xf32>, vector<16x16xf32> -> vector<16x16xf32>
    "tpu.trace_stop"() : () -> ()
    %cst_50 = arith.constant 2.500000e-01 : f32
    %106 = vector.broadcast %cst_50 : f32 to vector<16x16xf32>
    %107 = arith.mulf %105, %106 : vector<16x16xf32>
    %cst_51 = arith.constant dense<0xFF800000> : vector<16xf32>
    %108 = vector.multi_reduction <maximumf>, %107, %cst_51 [1] : vector<16x16xf32> to vector<16xf32>
    %109 = vector.shape_cast %108 : vector<16xf32> to vector<16x1xf32>
    %110 = vector.broadcast %109 : vector<16x1xf32> to vector<16x16xf32>
    %111 = arith.subf %107, %110 : vector<16x16xf32>
    %112 = math.exp %111 : vector<16x16xf32>
    %cst_52 = arith.constant dense<0.000000e+00> : vector<16xf32>
    %113 = vector.multi_reduction <add>, %112, %cst_52 [1] : vector<16x16xf32> to vector<16xf32>
    %114 = vector.shape_cast %113 : vector<16xf32> to vector<16x1xf32>
    %115 = tpu.reciprocal %114 {approx = true} : vector<16x1xf32> -> vector<16x1xf32>
    %116 = vector.broadcast %115 : vector<16x1xf32> to vector<16x16xf32>
    %117 = arith.mulf %112, %116 : vector<16x16xf32>
    %118 = vector.broadcast %102 : vector<1x32xf32> to vector<16x32xf32>
    %119 = arith.mulf %66, %118 : vector<16x32xf32>
    "tpu.trace_start"() <{level = 10 : i32, message = "nm,md->nd"}> : () -> ()
    %cst_53 = arith.constant dense<0.000000e+00> : vector<16x32xf32>
    %120 = tpu.matmul %117, %119, %cst_53 {dimension_numbers = #tpu.dot_dimension_numbers<[1], [0], [0], [1], [0, 0, 1, 1], [], []>} : vector<16x16xf32>, vector<16x32xf32>, vector<16x32xf32> -> vector<16x32xf32>
    "tpu.trace_stop"() : () -> ()
    %121 = arith.subf %95, %120 : vector<16x32xf32>
    %c0_54 = arith.constant 0 : index
    %c0_55 = arith.constant 0 : index
    %c0_56 = arith.constant 0 : index
    %c0_57 = arith.constant 0 : index
    %122 = vector.load %arg15[%c0_54, %c0_55, %c0_56, %c0_57] : memref<1x1x16x32xf32, #tpu.memory_space<vmem>>, vector<1x1x16x32xf32>
    %123 = vector.shape_cast %122 : vector<1x1x16x32xf32> to vector<16x32xf32>
    %124 = vector.shape_cast %121 : vector<16x32xf32> to vector<1x1x16x32xf32>
    tpu.vector_store %arg15[%c0_54, %c0_55, %c0_56, %c0_57], %124 {strides = array<i32>} : memref<1x1x16x32xf32, #tpu.memory_space<vmem>>, vector<1x1x16x32xf32>,
    %c0_58 = arith.constant 0 : index
    %c0_59 = arith.constant 0 : index
    %125 = vector.load %arg9[%c0_58, %c0_59] : memref<32x32xf32, #tpu.memory_space<vmem>>, vector<32x32xf32>
    %cst_60 = arith.constant dense<0.000000e+00> : vector<16x32xf32>
    %126 = tpu.matmul %121, %125, %cst_60 {dimension_numbers = #tpu.dot_dimension_numbers<[1], [0], [0], [1], [0, 0, 1, 1], [], []>} : vector<16x32xf32>, vector<32x32xf32>, vector<16x32xf32> -> vector<16x32xf32>
    %c0_61 = arith.constant 0 : index
    %c0_62 = arith.constant 0 : index
    %127 = vector.load %arg10[%c0_61, %c0_62] : memref<1x32xf32, #tpu.memory_space<vmem>>, vector<1x32xf32>
    %128 = vector.broadcast %127 : vector<1x32xf32> to vector<16x32xf32>
    %129 = arith.addf %126, %128 : vector<16x32xf32>
    %c0_63 = arith.constant 0 : index
    %c0_64 = arith.constant 0 : index
    %130 = vector.load %arg11[%c0_63, %c0_64] : memref<32x32xf32, #tpu.memory_space<vmem>>, vector<32x32xf32>
    %cst_65 = arith.constant dense<0.000000e+00> : vector<16x32xf32>
    %131 = tpu.matmul %129, %130, %cst_65 {dimension_numbers = #tpu.dot_dimension_numbers<[1], [0], [0], [1], [0, 0, 1, 1], [], []>} : vector<16x32xf32>, vector<32x32xf32>, vector<16x32xf32> -> vector<16x32xf32>
    %c0_66 = arith.constant 0 : index
    %c0_67 = arith.constant 0 : index
    %132 = vector.load %arg12[%c0_66, %c0_67] : memref<1x32xf32, #tpu.memory_space<vmem>>, vector<1x32xf32>
    %133 = vector.broadcast %132 : vector<1x32xf32> to vector<16x32xf32>
    %134 = arith.addf %131, %133 : vector<16x32xf32>
    %c0_68 = arith.constant 0 : index
    %c0_69 = arith.constant 0 : index
    %135 = vector.load %arg13[%c0_68, %c0_69] : memref<1x32xf32, #tpu.memory_space<vmem>>, vector<1x32xf32>
    "tpu.trace_start"() <{level = 10 : i32, message = "oh,nh->on"}> : () -> ()
    %cst_70 = arith.constant dense<0.000000e+00> : vector<1x16xf32>
    %136 = tpu.matmul %135, %134, %cst_70 {dimension_numbers = #tpu.dot_dimension_numbers<[1], [1], [0], [0], [0, 0, 1, 0], [], []>} : vector<1x32xf32>, vector<16x32xf32>, vector<1x16xf32> -> vector<1x16xf32>
    "tpu.trace_stop"() : () -> ()
    %c0_71 = arith.constant 0 : index
    %c0_72 = arith.constant 0 : index
    %137 = vector.load %arg14[%c0_71, %c0_72] : memref<1x1xf32, #tpu.memory_space<vmem>>, vector<1x1xf32>
    %138 = vector.broadcast %137 : vector<1x1xf32> to vector<1x16xf32>
    %139 = arith.addf %136, %138 : vector<1x16xf32>
    %c0_73 = arith.constant 0 : index
    %c0_74 = arith.constant 0 : index
    %c0_75 = arith.constant 0 : index
    %c0_76 = arith.constant 0 : index
    %140 = vector.load %arg16[%c0_73, %c0_74, %c0_75, %c0_76] : memref<1x1x1x16xf32, #tpu.memory_space<vmem>>, vector<1x1x1x16xf32>
    %141 = vector.shape_cast %140 : vector<1x1x1x16xf32> to vector<1x16xf32>
    %142 = vector.shape_cast %139 : vector<1x16xf32> to vector<1x1x1x16xf32>
    tpu.vector_store %arg16[%c0_73, %c0_74, %c0_75, %c0_76], %142 {strides = array<i32>} : memref<1x1x1x16xf32, #tpu.memory_space<vmem>>, vector<1x1x1x16xf32>,
    return
  }
  func.func @transform_0(%arg0: i32, %arg1: i32) -> (i32, i32, i32, i32) {
    %c0_i32 = arith.constant 0 : i32
    %c0_i32_0 = arith.constant 0 : i32
    %c0_i32_1 = arith.constant 0 : i32
    %c0_i32_2 = arith.constant 0 : i32
    return %arg0, %c0_i32, %c0_i32_0, %c0_i32_1 : i32, i32, i32, i32
  }
  func.func @transform_1(%arg0: i32, %arg1: i32) -> (i32, i32) {
    %c0_i32 = arith.constant 0 : i32
    %c0_i32_0 = arith.constant 0 : i32
    %c0_i32_1 = arith.constant 0 : i32
    return %c0_i32, %c0_i32_0 : i32, i32
  }
  func.func @transform_2(%arg0: i32, %arg1: i32) -> i32 {
    %c0_i32 = arith.constant 0 : i32
    %c0_i32_0 = arith.constant 0 : i32
    return %c0_i32 : i32
  }
  func.func @transform_3(%arg0: i32, %arg1: i32) -> (i32, i32, i32, i32) {
    %c0_i32 = arith.constant 0 : i32
    %c0_i32_0 = arith.constant 0 : i32
    %c0_i32_1 = arith.constant 0 : i32
    return %arg0, %arg1, %c0_i32, %c0_i32_0 : i32, i32, i32, i32
  }
  func.func @transform_4(%arg0: i32, %arg1: i32) -> (i32, i32) {
    %c0_i32 = arith.constant 0 : i32
    %c0_i32_0 = arith.constant 0 : i32
    %c0_i32_1 = arith.constant 0 : i32
    return %c0_i32, %c0_i32_0 : i32, i32
  }
  func.func @transform_5(%arg0: i32, %arg1: i32) -> (i32, i32) {
    %c0_i32 = arith.constant 0 : i32
    %c0_i32_0 = arith.constant 0 : i32
    %c0_i32_1 = arith.constant 0 : i32
    return %c0_i32, %c0_i32_0 : i32, i32
  }
  func.func @transform_6(%arg0: i32, %arg1: i32) -> (i32, i32) {
    %c0_i32 = arith.constant 0 : i32
    %c0_i32_0 = arith.constant 0 : i32
    %c0_i32_1 = arith.constant 0 : i32
    return %c0_i32, %c0_i32_0 : i32, i32
  }
  func.func @transform_7(%arg0: i32, %arg1: i32) -> (i32, i32) {
    %c0_i32 = arith.constant 0 : i32
    %c0_i32_0 = arith.constant 0 : i32
    %c0_i32_1 = arith.constant 0 : i32
    return %c0_i32, %c0_i32_0 : i32, i32
  }
  func.func @transform_8(%arg0: i32, %arg1: i32) -> (i32, i32) {
    %c0_i32 = arith.constant 0 : i32
    %c0_i32_0 = arith.constant 0 : i32
    %c0_i32_1 = arith.constant 0 : i32
    return %c0_i32, %c0_i32_0 : i32, i32
  }
  func.func @transform_9(%arg0: i32, %arg1: i32) -> (i32, i32) {
    %c0_i32 = arith.constant 0 : i32
    %c0_i32_0 = arith.constant 0 : i32
    %c0_i32_1 = arith.constant 0 : i32
    return %c0_i32, %c0_i32_0 : i32, i32
  }
  func.func @transform_10(%arg0: i32, %arg1: i32) -> (i32, i32) {
    %c0_i32 = arith.constant 0 : i32
    %c0_i32_0 = arith.constant 0 : i32
    %c0_i32_1 = arith.constant 0 : i32
    return %c0_i32, %c0_i32_0 : i32, i32
  }
  func.func @transform_11(%arg0: i32, %arg1: i32) -> (i32, i32) {
    %c0_i32 = arith.constant 0 : i32
    %c0_i32_0 = arith.constant 0 : i32
    %c0_i32_1 = arith.constant 0 : i32
    return %c0_i32, %c0_i32_0 : i32, i32
  }
  func.func @transform_12(%arg0: i32, %arg1: i32) -> (i32, i32) {
    %c0_i32 = arith.constant 0 : i32
    %c0_i32_0 = arith.constant 0 : i32
    %c0_i32_1 = arith.constant 0 : i32
    return %c0_i32, %c0_i32_0 : i32, i32
  }
  func.func @transform_13(%arg0: i32, %arg1: i32) -> (i32, i32, i32, i32) {
    %c0_i32 = arith.constant 0 : i32
    %c0_i32_0 = arith.constant 0 : i32
    %c0_i32_1 = arith.constant 0 : i32
    return %arg0, %arg1, %c0_i32, %c0_i32_0 : i32, i32, i32, i32
  }
  func.func @transform_14(%arg0: i32, %arg1: i32) -> (i32, i32, i32, i32) {
    %c0_i32 = arith.constant 0 : i32
    %c0_i32_0 = arith.constant 0 : i32
    %c0_i32_1 = arith.constant 0 : i32
    return %arg0, %arg1, %c0_i32, %c0_i32_0 : i32, i32, i32, i32
  }
}

</mosaic_0001>

<bundles_post_ra>
// kernel: physics_st_forward.1
= control target key start
LH: loop header
LB: loop body
LE: loop exit
PB: predicated region body
PF: predicated region fallthrough
CT: control target
= control target key end

     0   :  { %s2620_s0 = inlined_call_operand.vmem [shape: f32[2,8,16,32], index: 0, kind: input, shape index: {}]   ;;  %s2621_s1 = inlined_call_operand.vmem [shape: f32[4,8], index: 1, kind: input, shape index: {}]   ;;  %s2622_s2 = inlined_call_operand.vmem [shape: f32[4], index: 2, kind: input, shape index: {}]   ;;  %s2623_s3 = inlined_call_operand.vmem [shape: f32[2,4,16,32], index: 3, kind: input, shape index: {}]   ;;  %s2624_s4 = inlined_call_operand.vmem [shape: f32[16,16], index: 4, kind: input, shape index: {}]   ;;  %s2625_s5 = inlined_call_operand.vmem [shape: f32[32,32], index: 5, kind: input, shape index: {}]   ;;  %s2626_s6 = inlined_call_operand.vmem [shape: f32[1,32], index: 6, kind: input, shape index: {}]   ;;  %s2627_s7 = inlined_call_operand.vmem [shape: f32[32,32], index: 7, kind: input, shape index: {}]   ;;  %s2628_s8 = inlined_call_operand.vmem [shape: f32[1,32], index: 8, kind: input, shape index: {}]   ;;  %s2629_s9 = inlined_call_operand.vmem [shape: f32[32,32], index: 9, kind: input, shape index: {}]   ;;  %s2630_s10 = inlined_call_operand.vmem [shape: f32[1,32], index: 10, kind: input, shape index: {}]   ;;  %s2631_s11 = inlined_call_operand.vmem [shape: f32[1,32], index: 11, kind: input, shape index: {}]   ;;  %s2632_s12 = inlined_call_operand.<no memory space> [shape: f32[1,1], index: 12, kind: input, shape index: {}]   ;;  %s2633_s13 = inlined_call_operand.vmem [shape: f32[2,4,16,32], index: 13, kind: output, shape index: {0}]   ;;  %s2634_s14 = inlined_call_operand.hbm [shape: f32[2,4,1,16], index: 14, kind: output, shape index: {1}]  }
   0x1   :  { %2648 = sst [smem:[#allocation20_spill]] %s2621_s1  ;;  %v20_v0 = vstv %s2632_s12 }
   0x2   :  { %2649 = sst [smem:[#allocation21_spill]] %s2622_s2  ;;  %21 = vst [vmem:[#allocation2] sm:$0x1] %v20_v0 }
   0x3   :  { %2650 = sst [smem:[#allocation22_spill]] %s2634_s14 }
   0x4   :  { %22 = vsyncpa [#allocation5], 0 }
   0x5   :  { %23 = vsyncpa [#allocation7], 0 }
   0x6   :  { %24 = vsyncpa [#allocation4], 0 }
   0x7   :  { %26 = vsyncpa [#allocation4 + $0x1], 0  ;;  %s2255_s15 = smov 0   ;;  %s2257_s16 = smov 0  }
   0x8   :  { %s2259_s17 = smov 0   ;;  %s2261_s18 = smov 0  }
   0x9   :  { %s2263_s19 = smov 0   ;;  %s2265_s20 = smov 0  }
   0xa   :  { %s2267_s21 = smov 0   ;;  %s2269_s12 = smov 0  }
   0xb LB: > { %2651 = sst [smem:[#allocation12_spill]] %s2140_s15  ;;  %s1686_s22 = sadd.s32 4294967295, %s2168_s12   ;;  %s2168_s12 = sphi %s2269_s12, %s32_s12   ;;  %s2164_s21 = sphi %s2267_s21, %s2680_s21   ;;  %s2160_s20 = sphi %s2265_s20, %s2679_s20   ;;  %s2156_s19 = sphi %s2263_s19, %s2678_s19   ;;  %s2152_s18 = sphi %s2261_s18, %s2677_s18   ;;  %s2148_s17 = sphi %s2259_s17, %s2683_s17   ;;  %s2144_s16 = sphi %s2257_s16, %s2682_s16   ;;  %s2140_s15 = sphi %s2255_s15, %s2681_s15  }
   0xc   : > { %2652 = sst [smem:[#allocation13_spill]] %s2160_s20  ;;  %s1687_s23 = sadd.s32 4294967294, %s2168_s12  }
   0xd   : > { %2653 = sst [smem:[#allocation14_spill]] %s2164_s21  ;;  %s41_s24 = sadd.s32 1, %s2160_s20 }
   0xe   : > { %2654 = sst [smem:[#allocation15_spill]] %s2168_s12  ;;  %s44_s25 = sadd.s32 1, %s2164_s21 }
   0xf   : > { %p42_p0 = scmp.ge.s32.totalorder %s41_s24, 4  ;;  %s366_s26 = sadd.s32 1, %s2148_s17 }
  0x10   : > { %p376_p1 = scmp.ne.s32.totalorder %s2148_s17, %s2144_s16  ;;  %p377_p2 = scmp.eq.s32.totalorder %s1686_s22, 7 }
  0x11   : > { %s2685_s24 = smov (%p42_p0, %s41_s24), 0  ;;  %s2687_s25 = smov (!%p42_p0, %s44_s25), %s2164_s21 }
  0x12   : > { %2655 = sst [smem:[#allocation16_spill]] %s2685_s24  ;;  %s362_s27 = ssub.s32 %s2160_s20, %s2685_s24 }
  0x13   : > { %p2307_p3 = por %p377_p2, %p376_p1  ;;  %p46_p4 = scmp.ge.s32.totalorder %s2687_s25, 2 }
  0x14   : > { %p382_p5 = scmp.ne.s32.totalorder %s2144_s16, %s2140_s15  ;;  %p383_p6 = scmp.eq.s32.totalorder %s1687_s23, 7 }
  0x15   : > { %s2656_s28 = scalar_select %p2307_p3, 1, 0 }
  0x16   : > { %p1688_p7 = scmp.ge.s32.totalorder %s2168_s12, 1  ;;  %s2689_s25 = smov (%p46_p4, %s2687_s25), 0 }
  0x17   : > { %2657 = sst [smem:[#allocation17_spill]] %s2689_s25  ;;  %p2316_p8 = por %p383_p6, %p382_p5 }
  0x18   : > { %p390_p9 = scmp.lt.s32.totalorder %s2168_s12, 9  ;;  %s361_s30 = ssub.s32 %s2164_s21, %s2689_s25 }
  0x19   : > { %s2658_s29 = scalar_select %p2316_p8, 1, 0 }
  0x1a   : > { %s363_s14 = sor.u32 %s362_s27, %s361_s30  ;;  %p2323_p10 = pnand %p1688_p7, %p390_p9 }
  0x1b   : > { %2659 = sst [smem:[#allocation18_spill]] %s2658_s29  ;;  %p364_p11 = scmp.eq.s32.totalorder %s363_s14, 0 }
  0x1c   : > { %s2660_s24 = scalar_select %p2323_p10, 1, 0 }
  0x1d   : > { %p2327_p12 = scmp.eq.s32.totalorder %s1686_s22, 0  ;;  %p1929_p13 = pneg %p2323_p10 }
  0x1e   : > { %s2662_s1 = sld [smem:[#allocation20_spill]]  ;;  %s2665_s2 = sld [smem:[#allocation21_spill]] }
  0x1f   : > { %s2661_s20 = scalar_select %p2327_p12, 1, 0 }
  0x20   : > { %s2337_s12 = scalar_select %p364_p11, %s2148_s17, %s366_s26  }
  0x21   : > { %p2341_p0 = pnand %p2327_p12, %p1929_p13 }
  0x22   : > { %2663 = sst [smem:[#allocation19_spill]] %s2337_s12 }
  0x23   : > { %p2038_p2 = pneg %p2341_p0 }
  0x24   : > { %s403_s29 = sshll.u32 %s2662_s1, 4  ;;  %s414_s30 = sshll.u32 %s2665_s2, 4  ;;  %s404_s29 = int_to_ptr.vmem [resolvable:$true] %s403_s29  ;;  %s415_s30 = int_to_ptr.vmem [resolvable:$true] %s414_s30 }
  0x25   : > { %s2036_s25 = scalar_lea.vmem %s404_s29, 64  ;;  %p2044_p6 = scmp.lt.s32.totalorder %s404_s29, %s404_s29 }
  0x26   : > { %p2037_p1 = scmp.ne.s32.totalorder %s404_s29, %s2036_s25  ;;  %p2045_p7 = scmp.lt.s32.totalorder %s2036_s25, %s2036_s25 }
  0x28   : > { %p2039_p4 = pnand %p2038_p2, %p2037_p1  ;;  %p2046_p9 = por %p2045_p7, %p2044_p6 }
  0x2a   : > { %p2040_p5 = pneg %p2039_p4 }
  0x2c   : > { %p2047_p11 = pnand %p2046_p9, %p2040_p5 }
  0x2e   : > { %2050 = shalt.err (!%p2047_p11)
}
  0x2f   : > { %s2170_s15 = smov [#allocation3]   ;;  %s2051_s26 = scalar_lea.vmem %s415_s30, 16 }
  0x30   : > { %1932 = dma.vmem_to_smem (!%p2341_p0), %s404_s29, 64, %s2170_s15, [#allocation5]  }
  0x31   : > { %p2052_p13 = scmp.ne.s32.totalorder %s415_s30, %s2051_s26  ;;  %p2059_p12 = scmp.lt.s32.totalorder %s415_s30, %s415_s30 }
  0x32   : > { %p2060_p10 = scmp.lt.s32.totalorder %s2051_s26, %s2051_s26 }
  0x33   : > { %p2054_p8 = pnand %p2052_p13, %p2038_p2 }
  0x34   : > { %p2061_p1 = por %p2060_p10, %p2059_p12 }
  0x35   : > { %p2055_p3 = pneg %p2054_p8 }
  0x37   : > { %p2062_p4 = pnand %p2061_p1, %p2055_p3 }
  0x39   : > { %2065 = shalt.err (!%p2062_p4)
}
  0x3a   : > { %s2171_s23 = smov [#allocation6]   ;;  %p2666_p5 = scmp.ne.s32.totalorder %s2660_s24, 0 }
  0x3b   : > { %1935 = dma.vmem_to_smem (!%p2341_p0), %s415_s30, 16, %s2171_s23, [#allocation7]  }
  0x3c   : > { %474 = sbr.rel (%p2666_p5) target bundleno = 1544 (0x608), region = 72  ;;  %p2667_p6 = scmp.ne.s32.totalorder (!%p2666_p5), %s2661_s20, 0 }
  0x43   : > { %2127 = dma.done.wait (%p2667_p6), [#allocation5], 64  }
  0x44   : > { %2129 = vsyncadd (%p2667_p6), [#allocation5], 4294967232 }
  0x45   : > { %2131 = dma.done.wait (%p2667_p6), [#allocation7], 16  }
  0x46   : > { %2133 = vsyncadd (%p2667_p6), [#allocation7], 4294967280 }
  0x47   : > { %484 = sfence }
  0x48   : > { %p542_p3 = scmp.lt.s32.totalorder %s2156_s19, 1  ;;  %s2366_s25 = sshll.u32 %s2152_s18, 7  ;;  %v646_v1 = vld [vmem:[%s2624_s4] sm:$0xff]  ;;  %vm648_vm0 = vcmask 130048   ;;  %v731_v3 = vld [vmem:[%s2625_s5 + $0x8] sm:$0xff]  ;;  %v732_v5 = vld [vmem:[%s2625_s5 + $0x10] sm:$0xff]  ;;  %v827_v50 = vlaneseq }
  0x49   : > { %s566_s27 = sld [smem:[#allocation3 + %s2366_s25]]  ;;  %s572_s14 = sadd.s32 1, %s2366_s25  ;;  %1796 = vmatprep.mubr.msk.f32.mxu0 %vm648_vm0, %v646_v1  ;;  %v730_v2 = vld [vmem:[%s2625_s5] sm:$0xff]  ;;  %v733_v6 = vld [vmem:[%s2625_s5 + $0x18] sm:$0xff]  ;;  %vm741_vm2 = vcmask 261120   ;;  %vm2174_vm7 = vmmov 0  }
  0x4a   : > { %s2381_s26 = scalar_select %p542_p3, %s2156_s19, 1  ;;  %v1871_v4 = vpack.c.bf16 %v731_v3, %v730_v2  ;;  %v1875_v7 = vpack.c.bf16 %v733_v6, %v732_v5  ;;  %v828_v59 = vand.u32 127, %v827_v50  ;;  %vm2462_vm3 = vmpackc.low %vm741_vm2, %vm741_vm2  ;;  %vm1505_vm8 = vcmask 122880  }
  0x4b   : > { %s573_s2 = sld [smem:[#allocation3 + %s572_s14]]  ;;  %s582_s20 = sadd.s32 2, %s2366_s25 }
  0x4c   : > { %s1750_s22 = sshll.u32 %s2381_s26, 7  ;;  %s2391_s30 = sld [smem:[#allocation3 + %s582_s20]]  ;;  %1872 = vmatprep.subr.bf16.mxu1 %v1871_v4  ;;  %vm830_vm1 = vcmp.lt.s32.totalorder %v828_v59, 16  ;;  %vm1032_vm4 = vcmp.ge.s32.totalorder %v828_v59, 16  ;;  %vm1033_vm5 = vcmp.lt.s32.totalorder %v828_v59, 32 }
  0x4d   : > { %s2396_s12 = scalar_lea.vmem %s2620_s0, %s1750_s22  ;;  %s592_s1 = sadd.s32 3, %s2366_s25  ;;  %1874 = vmatpush3.bf16.msra.mxu1 %v1871_v4  ;;  %vm1034_vm6 = vmand %vm1032_vm4, %vm1033_vm5 }
  0x4e   : > { %v567_v8 = vld [vmem:[%s2396_s12] sm:$0xff]  ;;  %v568_v9 = vld [vmem:[%s2396_s12 + $0x8] sm:$0xff]  ;;  %s2401_s14 = sld [smem:[#allocation3 + %s592_s1]]  ;;  %s602_s23 = sadd.s32 4, %s2366_s25  ;;  %1876 = vmatprep.subr.bf16.mxu1 %v1875_v7  ;;  %v1704_v11 = vld [vmem:[%s2396_s12 + $0x10] sm:$0xff] }
  0x4f   : > { %v569_v10 = vstv %s566_s27  ;;  %v1705_v12 = vld [vmem:[%s2396_s12 + $0x18] sm:$0xff]  ;;  %s2406_s21 = sld [smem:[#allocation3 + %s602_s23]]  ;;  %s612_s24 = sadd.s32 5, %s2366_s25  ;;  %v1706_v15 = vld [vmem:[%s2396_s12 + $0x20] sm:$0xff]  ;;  %v1707_v16 = vld [vmem:[%s2396_s12 + $0x28] sm:$0xff] }
  0x50   : > { %v570_v13 = vmul.f32 %v569_v10, %v567_v8  ;;  %v571_v14 = vmul.f32 %v569_v10, %v568_v9  ;;  %s2411_s29 = sld [smem:[#allocation3 + %s612_s24]]  ;;  %s622_s20 = sadd.s32 6, %s2366_s25  ;;  %v1708_v21 = vld [vmem:[%s2396_s12 + $0x30] sm:$0xff]  ;;  %v1709_v22 = vld [vmem:[%s2396_s12 + $0x38] sm:$0xff]  ;;  %v1710_v25 = vld [vmem:[%s2396_s12 + $0x40] sm:$0xff] }
  0x51   : > { %v577_v17 = vstv %s573_s2  ;;  %s2414_s27 = sld [smem:[#allocation3 + %s622_s20]]  ;;  %s632_s22 = sadd.s32 7, %s2366_s25  ;;  %1878 = vmatpush3.bf16.msra.mxu1 %v1875_v7  ;;  %v1711_v26 = vld [vmem:[%s2396_s12 + $0x48] sm:$0xff]  ;;  %v1712_v33 = vld [vmem:[%s2396_s12 + $0x50] sm:$0xff]  ;;  %v1713_v34 = vld [vmem:[%s2396_s12 + $0x58] sm:$0xff]  ;;  %v2172_v7 = vmov 0.0  }
  0x52   : > { %v578_v18 = vmul.f32 %v1704_v11, %v577_v17  ;;  %v579_v19 = vmul.f32 %v1705_v12, %v577_v17  ;;  %v587_v20 = vstv %s2391_s30  ;;  %s2420_s15 = sld [smem:[#allocation3 + %s632_s22]]  ;;  %p549_p8 = scmp.lt.s32.totalorder %s2152_s18, 3  ;;  %v1714_v40 = vld [vmem:[%s2396_s12 + $0x60] sm:$0xff]  ;;  %v1715_v41 = vld [vmem:[%s2396_s12 + $0x68] sm:$0xff]  ;;  %v1716_v47 = vld [vmem:[%s2396_s12 + $0x70] sm:$0xff]  ;;  %v2458_v8 = vsel %vm830_vm1, 1.0, %v2172_v7 }
  0x53   : > { %v588_v23 = vmul.f32 %v1706_v15, %v587_v20  ;;  %v589_v24 = vmul.f32 %v1707_v16, %v587_v20  ;;  %s1698_s2 = sshll.u32 %s2381_s26, 3  ;;  %s2436_s30 = sld [smem:[#allocation6 + %s2152_s18]]  ;;  %v1717_v48 = vld [vmem:[%s2396_s12 + $0x78] sm:$0xff]  ;;  %v647_v10 = vld [vmem:[%s2624_s4 + $0x8] sm:$0xff]  ;;  %v2479_v12 = vsel %vm1034_vm6, 1.0, %v2172_v7 }
  0x54   : > { %v580_v27 = vadd.f32 %v578_v18, %v570_v13  ;;  %v581_v28 = vadd.f32 %v579_v19, %v571_v14  ;;  %v597_v29 = vstv %s2401_s14  ;;  %s550_s25 = scalar_select %p549_p8, %s2152_s18, 3 }
  0x55   : > { %v598_v30 = vmul.f32 %v1708_v21, %v597_v29  ;;  %v599_v31 = vmul.f32 %v1709_v22, %v597_v29  ;;  %v607_v32 = vstv %s2406_s21  ;;  %s1746_s20 = sshll.u32 %s2156_s19, 2  ;;  %p2671_p12 = scmp.ne.s32.totalorder %s2656_s28, 0 }
  0x56   : > { %v590_v35 = vadd.f32 %v588_v23, %v580_v27  ;;  %v591_v36 = vadd.f32 %v589_v24, %v581_v28  ;;  %v608_v37 = vmul.f32 %v1710_v25, %v607_v32  ;;  %v609_v38 = vmul.f32 %v1711_v26, %v607_v32  ;;  %s1697_s26 = sshll.u32 %s550_s25, 1 }
  0x57   : > { %v617_v39 = vstv %s2411_s29  ;;  %v627_v42 = vstv %s2414_s27  ;;  %s2438_s1 = sadd.s32 %s1698_s2, %s1697_s26  ;;  %s540_s29 = sand.u32 1, %s2144_s16  }
  0x58   : > { %v600_v43 = vadd.f32 %v598_v30, %v590_v35  ;;  %v601_v44 = vadd.f32 %v599_v31, %v591_v36  ;;  %v618_v45 = vmul.f32 %v1712_v33, %v617_v39  ;;  %v619_v46 = vmul.f32 %v1713_v34, %v617_v39  ;;  %s1699_s14 = sshll.u32 %s2438_s1, 3  ;;  %s1530_s27 = sadd.s32 %s2152_s18, %s1746_s20 }
  0x59   : > { %v637_v49 = vstv %s2420_s15  ;;  %v628_v53 = vmul.f32 %v1714_v40, %v627_v42  ;;  %v629_v54 = vmul.f32 %v1715_v41, %v627_v42  ;;  %s555_s12 = scalar_lea.vmem %s2623_s3, %s1699_s14  ;;  %v643_v62 = vstv %s2436_s30  ;;  %s564_s15 = scalar_lea.vmem %s2633_s13, %s1699_s14 }
  0x5a   : > { %v610_v51 = vadd.f32 %v608_v37, %v600_v43  ;;  %v611_v52 = vadd.f32 %v609_v38, %v601_v44  ;;  %v638_v57 = vmul.f32 %v1716_v47, %v637_v49  ;;  %v639_v58 = vmul.f32 %v1717_v48, %v637_v49  ;;  %v825_v1 = vld [vmem:[%s555_s12] sm:$0xff]  ;;  %v826_v2 = vld [vmem:[%s555_s12 + $0x8] sm:$0xff]  ;;  %s1747_s22 = sshll.u32 %s1530_s27, 4  ;;  %s2670_s30 = sld [smem:[#allocation22_spill]] }
  0x5b   : > { %v1879_v6 = vpack.c.bf16 %v826_v2, %v825_v1  ;;  %v834_v11 = vmul.f32 %v2458_v8, %v825_v1  ;;  %v835_v13 = vmul.f32 %v2458_v8, %v826_v2  ;;  %v1037_v14 = vmul.f32 %v2479_v12, %v825_v1  ;;  %s1517_s18 = scalar_lea.sflag [#allocation4], %s540_s29  ;;  %s2176_s26 = smov [#allocation8]  }
  0x5c   : > { %v620_v55 = vadd.f32 %v618_v45, %v610_v51  ;;  %v621_v56 = vadd.f32 %v619_v46, %v611_v52  ;;  %v1038_v15 = vmul.f32 %v2479_v12, %v826_v2  ;;  %v1720_v51 = vld [vmem:[%s2626_s6] ss:$0 sm:$0xff]  ;;  %s2070_s23 = sshll.u32 %s2176_s26, 4  ;;  %s2071_s23 = int_to_ptr.vmem [resolvable:$false] %s2070_s23 }
  0x5d   : > { %s2072_s21 = scalar_lea.vmem %s2071_s23, 32 }
  0x5e   : > { %v630_v60 = vadd.f32 %v628_v53, %v620_v55  ;;  %v631_v61 = vadd.f32 %v629_v54, %v621_v56 }
  0x60   : > { %v640_v63 = vadd.f32 %v638_v57, %v630_v60  ;;  %v641_v0 = vadd.f32 %v639_v58, %v631_v61  ;;  %s2567_s14 = scalar_lea.hbm %s2670_s30, %s1747_s22 }
  0x62   : > { %v2451_v3 = vadd.f32 %v643_v62, %v640_v63  ;;  %v2453_v4 = vadd.f32 %v643_v62, %v641_v0 }
  0x64   : > { %v1867_v5 = vpack.c.bf16 %v2453_v4, %v2451_v3 }
  0x66   : > { %1868 = vmatprep.subr.bf16.mxu0 %v1867_v5 }
  0x67   : > { %1870 = vmatpush3.bf16.msra.mxu0 %v1867_v5 }
  0x68   : > { %1881 = vmatprep.subr.msk.bf16.mxu0 %vm2462_vm3, %v1879_v6 }
  0x6a   : > { %1797 = vmatmul.mubr.msk.f32.vlgmr.msra.gmra.mrb[0].mxu0 %vm648_vm0, %v647_v10 }
  0x6b   : > { %1814 = vmatprep.mubr.msk.f32.mxu0 %vm741_vm2, %v834_v11 }
  0x70   : > { %1884 = vmatpush3.bf16.xpose.msk.msra.mxu0 %vm2462_vm3, %v1879_v6 }
  0x71   : > { %1891 = vmatprep.subr.msk.bf16.mxu0 %vm2462_vm3, %v1879_v6 }
  0x77   : > { %1815 = vmatmul.mubr.msk.f32.vlgmr.msra.gmra.mrb[2].mxu0 %vm741_vm2, %v835_v13 }
  0x78   : > { %1894 = vmatpush3.bf16.xpose.msk.msra.mxu0 %vm2462_vm3, %v1879_v6  ;;  %1828 = vmatprep.mubr.msk.f32.mxu0 %vm741_vm2, %v1037_v14 }
  0x7f   : > { %1829 = vmatmul.mubr.msk.f32.vlgmr.msra.gmra.mrb[4].mxu0 %vm741_vm2, %v1038_v15 }
 0x13d   : > { %v1798_v16 = vpop.f32.mrb[0].mxu0 }
 0x13e   : > { %v721_v17 = vpop.f32.mrb[1].mxu0 }
 0x13f   : > { %1807 = vmatprep.mubr.msk.f32.mxu1 %vm741_vm2, %v721_v17  ;;  %v1232_v17 = vld [vmem:[%s2627_s7 + $0x8] sm:$0xff] }
 0x140   : > { %1808 = vmatmul.mubr.msk.f32.vlgmr.msra.gmra.mrb[0].mxu1 %vm741_vm2, %v1798_v16  ;;  %v1231_v16 = vld [vmem:[%s2627_s7] sm:$0xff] }
 0x14a   : > { %v1816_v18 = vpop.f32.mrb[2].mxu0 }
 0x14b   : > { %v914_v19 = vpop.f32.mrb[3].mxu0  ;;  %v924_v21 = vmul.f32 0.25, %v1816_v18  ;;  %v1899_v18 = vpack.c.bf16 %v1232_v17, %v1231_v16 }
 0x14c   : > { %v923_v20 = vmul.f32 0.25, %v914_v19  ;;  %v1233_v19 = vld [vmem:[%s2627_s7 + $0x10] sm:$0xff] }
 0x14d   : > { %v928_v24 = vsel %vm648_vm0, %v924_v21, -inf }
 0x14e   : > { %v925_v22 = vsel %vm648_vm0, %v923_v20, -inf }
 0x14f   : > { %926 = vmax.xlane.f32.xlu0 %v925_v22  ;;  %v1323_v22 = vld [vmem:[%s2629_s9] sm:$0xff] }
 0x152   : > { %v1830_v23 = vpop.f32.mrb[4].mxu0 }
 0x153   : > { %v1111_v25 = vpop.f32.mrb[5].mxu0  ;;  %929 = vmax.xlane.f32.xlu0 %v928_v24  ;;  %v1121_v27 = vmul.f32 0.25, %v1830_v23  ;;  %v1324_v23 = vld [vmem:[%s2629_s9 + $0x8] sm:$0xff] }
 0x154   : > { %v1120_v26 = vmul.f32 0.25, %v1111_v25  ;;  %v1907_v24 = vpack.c.bf16 %v1324_v23, %v1323_v22 }
 0x155   : > { %v1125_v29 = vsel %vm648_vm0, %v1121_v27, -inf }
 0x156   : > { %v1122_v28 = vsel %vm648_vm0, %v1120_v26, -inf  ;;  %1908 = vmatprep.subr.bf16.mxu0 %v1907_v24 }
 0x157   : > { %1123 = vmax.xlane.f32.xlu1 %v1122_v28  ;;  %1910 = vmatpush3.bf16.msra.mxu0 %v1907_v24 }
 0x15b   : > { %1126 = vmax.xlane.f32.xlu1 %v1125_v29 }
 0x1dc   : > { %v927_v30 = vpop.xlane.xlu0 %926 }
 0x1dd   : > { %v931_v31 = vsub.f32 %v923_v20, %v927_v30  ;;  %v1234_v20 = vld [vmem:[%s2627_s7 + $0x18] sm:$0xff] }
 0x1df   : > { %v933_v32 = vmul.f32 1.442695, %v931_v31 }
 0x1e0   : > { %v930_v33 = vpop.xlane.xlu0 %929 }
 0x1e1   : > { %2016 = vpow2.f32 %v933_v32  ;;  %v932_v34 = vsub.f32 %v924_v21, %v930_v33  ;;  %v1903_v21 = vpack.c.bf16 %v1234_v20, %v1233_v19 }
 0x1e3   : > { %v935_v35 = vmul.f32 1.442695, %v932_v34  ;;  %v1737_v34 = vld [vmem:[%s2628_s8] ss:$0 sm:$0xff] }
 0x1e4   : > { %v1124_v36 = vpop.xlane.xlu1 %1123 }
 0x1e5   : > { %2018 = vpow2.f32 %v935_v35  ;;  %v1128_v37 = vsub.f32 %v1120_v26, %v1124_v36 }
 0x1e7   : > { %v1130_v38 = vmul.f32 1.442695, %v1128_v37 }
 0x1e8   : > { %v1127_v39 = vpop.xlane.xlu1 %1126 }
 0x1e9   : > { %2020 = vpow2.f32 %v1130_v38  ;;  %v1129_v40 = vsub.f32 %v1121_v27, %v1127_v39  ;;  %v2173_v39 = vmov 0.0|0.0  }
 0x1eb   : > { %v2017_v41 = vpop.eup %2016  ;;  %v1132_v42 = vmul.f32 1.442695, %v1129_v40  ;;  %v1416_v40 = vld [vmem:[#allocation2] sm:$0x1] }
 0x1ec   : > { %v937_v43 = vsel %vm648_vm0, %v2017_v41, 0.0 }
 0x1ed   : > { %2022 = vpow2.f32 %v1132_v42  ;;  %938 = vadd.xlane.f32.xlu0 %v937_v43  ;;  %v1740_v42 = vld [vmem:[%s2630_s10] ss:$0 sm:$0xff] }
 0x1ef   : > { %v2019_v44 = vpop.eup %2018 }
 0x1f0   : > { %v940_v45 = vsel %vm648_vm0, %v2019_v44, 0.0 }
 0x1f1   : > { %941 = vadd.xlane.f32.xlu1 %v940_v45 }
 0x1f3   : > { %v2021_v46 = vpop.eup %2020 }
 0x1f4   : > { %v1134_v47 = vsel %vm648_vm0, %v2021_v46, 0.0 }
 0x1f5   : > { %1135 = vadd.xlane.f32.xlu0 %v1134_v47 }
 0x1f7   : > { %v2023_v48 = vpop.eup %2022 }
 0x1f8   : > { %v1137_v49 = vsel %vm648_vm0, %v2023_v48, 0.0 }
 0x1f9   : > { %1138 = vadd.xlane.f32.xlu1 %v1137_v49 }
 0x213   : > { %v1809_v52 = vpop.f32.mrb[0].mxu1 }
 0x214   : > { %v820_v53 = vadd.f32 %v1809_v52, %v1720_v51  ;;  %v814_v54 = vpop.f32.mrb[1].mxu1 }
 0x215   : > { %v815_v55 = vadd.f32 %v1720_v51, %v814_v54 }
 0x216   : > { %2024 = vtanh.f32 %v820_v53 }
 0x217   : > { %2026 = vtanh.f32 %v815_v55 }
 0x220   : > { %v2025_v56 = vpop.eup %2024 }
 0x221   : > { %v2027_v57 = vpop.eup %2026  ;;  %v948_v58 = vmul.f32 %v2025_v56, %v2458_v8  ;;  %v1145_v59 = vmul.f32 %v2025_v56, %v2479_v12 }
 0x222   : > { %v947_v60 = vmul.f32 %v2027_v57, %v2458_v8  ;;  %v1144_v61 = vmul.f32 %v2027_v57, %v2479_v12 }
 0x224   : > { %v1885_v62 = vpack.c.bf16 %v948_v58, %v947_v60  ;;  %v1895_v63 = vpack.c.bf16 %v1145_v59, %v1144_v61 }
 0x226   : > { %1886 = vmatprep.subr.bf16.mxu1 %v1885_v62 }
 0x227   : > { %1888 = vmatpush3.bf16.msra.mxu1 %v1885_v62 }
 0x228   : > { %1896 = vmatprep.subr.bf16.mxu1 %v1895_v63 }
 0x27a   : > { %v939_v0 = vpop.xlane.xlu0 %938 }
 0x27b   : > { %2028 = vrcp.f32 %v939_v0 }
 0x27e   : > { %v942_v1 = vpop.xlane.xlu1 %941 }
 0x27f   : > { %2030 = vrcp.f32 %v942_v1 }
 0x282   : > { %v1136_v2 = vpop.xlane.xlu0 %1135 }
 0x283   : > { %2032 = vrcp.f32 %v1136_v2 }
 0x285   : > { %v2029_v5 = vpop.eup %2028 }
 0x286   : > { %v1139_v6 = vpop.xlane.xlu1 %1138  ;;  %v945_v10 = vmul.f32 %v2029_v5, %v2017_v41  ;;  %v2175_v41 = vmov 0  }
 0x287   : > { %2034 = vrcp.f32 %v1139_v6  ;;  %2015 = vset.pattern.permute.xlu0 %v2175_v41 }
 0x288   : > { %1821 = vmatprep.mubr.msk.f32.mxu1 %vm648_vm0, %v945_v10  ;;  %1419 = vperm.xlu0 %2015, %v1416_v40  }
 0x289   : > { %v2031_v8 = vpop.eup %2030 }
 0x28a   : > { %v946_v11 = vmul.f32 %v2031_v8, %v2019_v44 }
 0x28c   : > { %1822 = vmatmul.mubr.msk.f32.vlgmr.msra.gmra.mrb[2].mxu1 %vm648_vm0, %v946_v11 }
 0x28d   : > { %v2033_v12 = vpop.eup %2032  ;;  %1898 = vmatpush3.bf16.msra.mxu1 %v1895_v63 }
 0x28e   : > { %v1142_v13 = vmul.f32 %v2033_v12, %v2021_v46  ;;  %1900 = vmatprep.subr.bf16.mxu1 %v1899_v18 }
 0x290   : > { %1835 = vmatprep.mubr.msk.f32.mxu1 %vm648_vm0, %v1142_v13 }
 0x291   : > { %v2035_v14 = vpop.eup %2034 }
 0x292   : > { %v1143_v15 = vmul.f32 %v2035_v14, %v2023_v48  ;;  %v1423_v48 = vshrl.u32 %v827_v50, 7 }
 0x294   : > { %1836 = vmatmul.mubr.msk.f32.vlgmr.msra.gmra.mrb[4].mxu1 %vm648_vm0, %v1143_v15  ;;  %v1424_v49 = vsub.s32 0, %v1423_v48 }
 0x295   : > { %1902 = vmatpush3.bf16.msra.mxu1 %v1899_v18 }
 0x296   : > { %1904 = vmatprep.subr.bf16.mxu1 %v1903_v21 }
 0x299   : > { %1906 = vmatpush3.bf16.msra.mxu1 %v1903_v21 }
 0x29a   : > { %1915 = vmatprep.subr.bf16.mxu1 %v2173_v39 }
 0x307   : > { %v1420_v51 = vpop.permute.xlu0 %1419 }
 0x308   : > { %v1425_v52 = vrot.slane %v1420_v51, %v1424_v49 }
 0x35f   : > { %v1823_v25 = vpop.f32.mrb[2].mxu1 }
 0x360   : > { %v1021_v26 = vpop.f32.mrb[3].mxu1  ;;  %v1031_v27 = vsub.f32 %v2453_v4, %v1823_v25  ;;  %v1326_v4 = vld [vmem:[%s2629_s9 + $0x18] sm:$0xff] }
 0x361   : > { %v1030_v28 = vsub.f32 %v2451_v3, %v1021_v26  ;;  %v1325_v3 = vld [vmem:[%s2629_s9 + $0x10] sm:$0xff] }
 0x362   : > { %v1911_v33 = vpack.c.bf16 %v1326_v4, %v1325_v3 }
 0x364   : > { %1912 = vmatprep.subr.bf16.mxu0 %v1911_v33 }
 0x365   : > { %1914 = vmatpush3.bf16.msra.mxu0 %v1911_v33 }
 0x367   : > { %v1837_v29 = vpop.f32.mrb[4].mxu1 }
 0x368   : > { %v1228_v30 = vsub.f32 %v1031_v27, %v1837_v29  ;;  %v1218_v31 = vpop.f32.mrb[5].mxu1 }
 0x369   : > { %v1227_v32 = vsub.f32 %v1030_v28, %v1218_v31 }
 0x36a   : > { %1230 = vst.msk [vmem:[%s564_s15 + $0x8] sm:$0xff] %vm741_vm2, %v1228_v30 }
 0x36b   : > { %1229 = vst.msk [vmem:[%s564_s15] sm:$0xff] %vm741_vm2, %v1227_v32  ;;  %1846 = vmatprep.mubr.msk.f32.mxu1 %vm741_vm2, %v1227_v32  ;;  %s541_s15 = scalar_lea.vmem [#allocation8], %s540_s29 }
 0x36c   : > { %1847 = vmatmul.mubr.msk.f32.vlgmr.msra.gmra.mrb[6].mxu1 %vm741_vm2, %v1228_v30  ;;  %s1534_s2 = sshll.u32 %s541_s15, 4  ;;  %s2569_s2 = int_to_ptr.vmem [resolvable:$true] %s1534_s2 }
 0x36d   : > { %1864 = vmatprep.mubr.msk.f32.mxu1 %vm2174_vm7, %v2172_v7  ;;  %v1415_v7 = vld [vmem:[%s2631_s11] sm:$0x1]  ;;  %s2066_s19 = scalar_lea.vmem %s2569_s2, 16  ;;  %p2073_p7 = scmp.lt.s32.totalorder %s2569_s2, %s2071_s23 }
 0x36e   : > { %p2067_p10 = scmp.ne.s32.totalorder %s2569_s2, %s2066_s19  ;;  %p2074_p9 = scmp.lt.s32.totalorder %s2072_s21, %s2066_s19 }
 0x370   : > { %p2068_p0 = pnand %p2067_p10, %p2671_p12  ;;  %p2075_p11 = por %p2074_p9, %p2073_p7 }
 0x372   : > { %p2069_p2 = pneg %p2068_p0 }
 0x374   : > { %p2076_p13 = pnand %p2075_p11, %p2069_p2 }
 0x43f   : > { %v1848_v35 = vpop.f32.mrb[6].mxu1 }
 0x440   : > { %v1314_v36 = vpop.f32.mrb[7].mxu1  ;;  %v1320_v38 = vadd.f32 %v1848_v35, %v1737_v34 }
 0x441   : > { %v1315_v37 = vadd.f32 %v1737_v34, %v1314_v36 }
 0x443   : > { %1857 = vmatprep.mubr.msk.f32.mxu0 %vm741_vm2, %v1315_v37 }
 0x444   : > { %1858 = vmatmul.mubr.msk.f32.vlgmr.msra.gmra.mrb[6].mxu0 %vm741_vm2, %v1320_v38 }
 0x517   : > { %v1859_v43 = vpop.f32.mrb[6].mxu0 }
 0x518   : > { %v1412_v44 = vadd.f32 %v1859_v43, %v1740_v42  ;;  %v1406_v45 = vpop.f32.mrb[7].mxu0 }
 0x519   : > { %v1407_v46 = vadd.f32 %v1740_v42, %v1406_v45 }
 0x51b   : > { %v1916_v47 = vpack.c.bf16 %v1412_v44, %v1407_v46 }
 0x51d   : > { %1918 = vmatpush3.bf16.xpose.msk.msra.mxu1 %vm2462_vm3, %v1916_v47 }
 0x524   : > { %1865 = vmatmul.mubr.msk.f32.vlgmr.msra.gmra.mrb[8].mxu1 %vm741_vm2, %v1415_v7 }
 0x5f7   : > { %v1501_v9 = vpop.f32.mrb[8].mxu1 }
 0x5f8   : > { %v1502_v53 = vadd.f32 %v1501_v9, %v1425_v52  ;;  %v1866_v54 = vpop.f32.mrb[9].mxu1 }
 0x5fa   : > { %1506 = vst.msk [vmem:[%s541_s15] sm:$0x1] %vm1505_vm8, %v1502_v53 }
 0x5fb   : > { %2079 = shalt.err (!%p2076_p13)
}
 0x5fc   : > { %s2080_s12 = scalar_lea.hbm %s2567_s14, 16  ;;  %s2084_s20 = scalar_lea.hbm %s2670_s30, 128 }
 0x5fd   : > { %p2081_p1 = scmp.ne.s32.totalorder %s2567_s14, %s2080_s12  ;;  %p2085_p6 = scmp.lt.u32.totalorder %s2567_s14, %s2670_s30 }
 0x5fe   : > { %p2086_p3 = scmp.lt.u32.totalorder %s2084_s20, %s2080_s12  ;;  %p2088_p10 = scmp.lt.u32.totalorder %s2080_s12, %s2567_s14 }
 0x5ff   : > { %p2082_p4 = pnand %p2081_p1, %p2671_p12 }
 0x600   : > { %p2087_p8 = por %p2086_p3, %p2085_p6 }
 0x601   : > { %p2083_p5 = pneg %p2082_p4 }
 0x602   : > { %p2089_p0 = por %p2088_p10, %p2087_p8 }
 0x604   : > { %p2090_p2 = pnand %p2089_p0, %p2083_p5 }
 0x606   : > { %2093 = shalt.err (!%p2090_p2)
}
 0x607   : > { %1927 = dma.vmem_to_hbm [thread:$0]  (%p2671_p12), %s2569_s2, 16, %s2567_s14, %s1517_s18  }
 0x608 PF: > { %s2672_s15 = sld [smem:[#allocation15_spill]]  ;;  %s2673_s25 = sld [smem:[#allocation12_spill]] }
 0x609   : > { %s2674_s1 = sld [smem:[#allocation18_spill]] }
 0x60e   : > { %p1944_p7 = scmp.ge.s32.totalorder %s2672_s15, 2  ;;  %s1558_s19 = sand.u32 1, %s2673_s25  }
 0x60f   : > { %p2675_p9 = scmp.ne.s32.totalorder %s2674_s1, 0  ;;  %s1559_s26 = scalar_lea.sflag [#allocation4], %s1558_s19 }
 0x611   : > { %p1937_p11 = pnand %p1944_p7, %p2675_p9 }
 0x613   : > { %2135 = dma.done.wait (!%p1937_p11), %s1559_s26, 16  }
 0x614   : > { %2137 = vsyncadd (!%p1937_p11), %s1559_s26, 4294967280  ;;  %s32_s12 = sadd.s32 1, %s2672_s15   ;;  %s2676_s28 = sld [smem:[#allocation19_spill]] }
 0x615   : > { %p29_p13 = scmp.ge.s32.totalorder %s32_s12, 10   ;;  %s2677_s18 = sld [smem:[#allocation13_spill]] }
 0x616   : > { %s2678_s19 = sld [smem:[#allocation14_spill]]  ;;  %s2679_s20 = sld [smem:[#allocation16_spill]] }
 0x617   : > { %s2680_s21 = sld [smem:[#allocation17_spill]]  ;;  %s2681_s15 = smov %s2144_s16 }
 0x618   : > { %s2682_s16 = smov %s2148_s17  ;;  %31 = sbr.rel (!%p29_p13) target bundleno = 11 (0xb), region = 138 }
 0x61a   : > { %s2683_s17 = smov %s2676_s28 }
 0x61f   :  { %1563 = vsyncpa [#allocation4], 1 }
 0x620   :  { %1565 = vsyncpa [#allocation4 + $0x1], 1 }
 0x621   :  { %1566 = vsyncpa [#allocation5], 1 }
 0x622   :  { %1568 = vsyncpa [#allocation5 + $0x1], 1 }
 0x623   :  { %1569 = vsyncpa [#allocation7], 1 }

</bundles_post_ra>
